<compile_context>
chip_gen: v6e
topology: v6e:2x2x1
jax: 0.10.0
libtpu: 0.0.40
codegen_flags: <defaults>
</compile_context>

<pallas_src>
import functools

import jax
import jax.numpy as jnp
from jax.experimental import pallas as pl
from jax.experimental.pallas import tpu as pltpu

# CartPole-like environment dims (env.observation_space.shape[0], env.action_space.n)
N_STATES = 4
N_ACTIONS = 2
HIDDEN = 50

# Kernel-side padded layout.
HIDDEN_PAD = 64   # 50 -> 64, zero-filled (exact: padded units are 0 after ReLU)
OUT_PAD = 8       # 2 -> 8 output columns (full-dim block exception; sliced outside)


def _net_kernel(x_ref, w1_ref, b1_ref, w2_ref, b2_ref, out_ref):
    x = x_ref[...]                    # (TB, N_STATES) f32
    w1 = w1_ref[...]                  # (N_STATES, HIDDEN_PAD) f32

    # fc1 as N_STATES unrolled VPU broadcast-FMAs (keeps the MXU out of the
    # K=4 contraction and stays f32 on the VPU -> also fine on v5e).
    h = x[:, 0:1] * w1[0:1, :]
    for k in range(1, N_STATES):
        h = h + x[:, k:k + 1] * w1[k:k + 1, :]
    h = jnp.maximum(h + b1_ref[...], 0.0)          # bias broadcast + ReLU (f32)

    # out = h @ W2 + b2 on the MXU, bf16 operands / f32 accumulation.
    o = jnp.dot(h.astype(jnp.bfloat16), w2_ref[...],
                preferred_element_type=jnp.float32)
    out_ref[...] = (o + b2_ref[...]).astype(out_ref.dtype)


def prepare_params(w1, b1, w2, b2):
    """One-time layout plumbing (do NOT call per forward pass).

    PyTorch layout in : w1 (HIDDEN, N_STATES), b1 (HIDDEN,),
                        w2 (N_ACTIONS, HIDDEN), b2 (N_ACTIONS,)
    Kernel layout out : w1p (N_STATES, HIDDEN_PAD) f32, b1p (1, HIDDEN_PAD) f32,
                        w2p (HIDDEN_PAD, OUT_PAD)  bf16, b2p (1, OUT_PAD)    f32
    Zero padding keeps the math exact (padded hidden units are 0 after ReLU and
    hit zero rows of W2; padded output columns are discarded).
    """
    w1 = jnp.asarray(w1, jnp.float32)
    b1 = jnp.asarray(b1, jnp.float32)
    w2 = jnp.asarray(w2, jnp.float32)
    b2 = jnp.asarray(b2, jnp.float32)

    w1p = jnp.zeros((N_STATES, HIDDEN_PAD), jnp.float32).at[:, :HIDDEN].set(w1.T)
    b1p = jnp.zeros((1, HIDDEN_PAD), jnp.float32).at[0, :HIDDEN].set(b1)
    w2p = (jnp.zeros((HIDDEN_PAD, OUT_PAD), jnp.float32)
           .at[:HIDDEN, :N_ACTIONS].set(w2.T)
           .astype(jnp.bfloat16))                  # bf16-native MXU on v6e/v7x
    b2p = jnp.zeros((1, OUT_PAD), jnp.float32).at[0, :N_ACTIONS].set(b2)
    return w1p, b1p, w2p, b2p


@functools.lru_cache(maxsize=None)
def _num_tensorcores():
    """Best-effort chip query: v7x has 2 TensorCores per chip, v5e/v6e have 1."""
    try:
        kind = jax.devices()[0].device_kind.lower()
        if "v7" in kind or "7x" in kind:
            return 2
    except Exception:
        pass
    return 1


def _round_up(x, m):
    return ((x + m - 1) // m) * m


def _pick_batch_tile(batch, num_tc):
    """Largest sublane-aligned batch tile (cap 2048).  On multi-TC chips split so
    the 'parallel' batch axis has >= num_tc grid steps (both cores get work)."""
    bp = _round_up(max(batch, 1), 8)
    cap = 2048
    if num_tc > 1 and batch >= 16:
        cap = min(cap, _round_up(pl.cdiv(bp, num_tc), 8))
    return min(bp, cap)


@jax.jit
def net_forward(x, params):
    """x: (B, N_STATES) float32; params from prepare_params(). Returns (B, N_ACTIONS).

    Note: B is a trace-time shape; bucket call-site batch sizes (e.g. acting path
    padded to 8, one fixed replay batch) so this jit sees at most a couple of shapes.
    """
    w1p, b1p, w2p, b2p = params
    B = x.shape[0]

    TB = _pick_batch_tile(B, _num_tensorcores())
    grid = (pl.cdiv(B, TB),)   # ragged tail block is masked by Pallas; no jnp.pad

    cost = pl.CostEstimate(
        flops=2 * B * (N_STATES * HIDDEN_PAD + HIDDEN_PAD * OUT_PAD),
        transcendentals=0,
        bytes_accessed=(B * N_STATES * 4 + B * OUT_PAD * 4
                        + N_STATES * HIDDEN_PAD * 4 + HIDDEN_PAD * 4
                        + HIDDEN_PAD * OUT_PAD * 2 + OUT_PAD * 4),
    )

    out = pl.pallas_call(
        _net_kernel,
        out_shape=jax.ShapeDtypeStruct((B, OUT_PAD), jnp.float32),
        grid=grid,
        in_specs=[
            pl.BlockSpec((TB, N_STATES), lambda i: (i, 0)),           # streamed activations
            pl.BlockSpec((N_STATES, HIDDEN_PAD), lambda i: (0, 0)),   # resident weights
            pl.BlockSpec((1, HIDDEN_PAD), lambda i: (0, 0)),
            pl.BlockSpec((HIDDEN_PAD, OUT_PAD), lambda i: (0, 0)),
            pl.BlockSpec((1, OUT_PAD), lambda i: (0, 0)),
        ],
        out_specs=pl.BlockSpec((TB, OUT_PAD), lambda i: (i, 0)),
        compiler_params=pltpu.CompilerParams(
            dimension_semantics=("parallel",)),                       # v7x: shard batch over 2 TCs
        cost_estimate=cost,
    )(x, w1p, b1p, w2p, b2p)

    # Tiny lane slice (8 -> 2 columns); kept outside to preserve forward semantics.
    return out[:, :N_ACTIONS]


def init_params(key):
    """Mirrors the PyTorch module init: weights ~ Normal(0, 0.1);
    biases use nn.Linear's default U(-1/sqrt(fan_in), 1/sqrt(fan_in))."""
    k1, k2, k3, k4 = jax.random.split(key, 4)
    w1 = 0.1 * jax.random.normal(k1, (HIDDEN, N_STATES), dtype=jnp.float32)
    b1 = jax.random.uniform(
        k2, (HIDDEN,), minval=-1.0 / jnp.sqrt(N_STATES),
        maxval=1.0 / jnp.sqrt(N_STATES), dtype=jnp.float32)
    w2 = 0.1 * jax.random.normal(k3, (N_ACTIONS, HIDDEN), dtype=jnp.float32)
    b2 = jax.random.uniform(
        k4, (N_ACTIONS,), minval=-1.0 / jnp.sqrt(HIDDEN),
        maxval=1.0 / jnp.sqrt(HIDDEN), dtype=jnp.float32)
    return w1, b1, w2, b2


if __name__ == "__main__":
    key = jax.random.PRNGKey(0)
    kx, kp = jax.random.split(key)

    batch = 8
    x = jax.random.normal(kx, (batch, N_STATES), dtype=jnp.float32)
    w1, b1, w2, b2 = init_params(kp)

    # Layout plumbing happens exactly once; the per-call path is just the kernel.
    params = prepare_params(w1, b1, w2, b2)

    actions_value = jax.block_until_ready(net_forward(x, params))

    # Pure-JAX f32 reference of the same forward pass (original PyTorch layout).
    ref = jnp.maximum(x @ w1.T + b1, 0.0) @ w2.T + b2
    assert actions_value.shape == (batch, N_ACTIONS)
    # W2 / h go through the MXU in bf16 (f32 accumulation) -> loosened tolerance.
    assert jnp.allclose(actions_value, ref, atol=2e-2, rtol=2e-2), (
        float(jnp.max(jnp.abs(actions_value - ref))))

    print("KERNEL_OK")
</pallas_src>

<mosaic_0001>
module attributes {stable_mosaic.version = 11 : i64} {
  func.func @_net_kernel(%arg0: i32, %arg1: memref<8x4xf32, #tpu.memory_space<vmem>>, %arg2: memref<4x64xf32, #tpu.memory_space<vmem>>, %arg3: memref<1x64xf32, #tpu.memory_space<vmem>>, %arg4: memref<64x8xbf16, #tpu.memory_space<vmem>>, %arg5: memref<1x8xf32, #tpu.memory_space<vmem>>, %arg6: memref<8x8xf32, #tpu.memory_space<vmem>>) attributes {dimension_semantics = [#tpu.dimension_semantics<parallel>], iteration_bounds = array<i64: 1>, scalar_prefetch = 0 : i64, scratch_operands = 0 : i64, tpu.core_type = #tpu.core_type<tc>, window_params = [{transform_indices = @transform_0, window_bounds = array<i64: 8, 4>}, {pipeline_mode = #tpu.pipeline_mode<synchronous>, transform_indices = @transform_1, window_bounds = array<i64: 4, 64>}, {pipeline_mode = #tpu.pipeline_mode<synchronous>, transform_indices = @transform_2, window_bounds = array<i64: 1, 64>}, {pipeline_mode = #tpu.pipeline_mode<synchronous>, transform_indices = @transform_3, window_bounds = array<i64: 64, 8>}, {pipeline_mode = #tpu.pipeline_mode<synchronous>, transform_indices = @transform_4, window_bounds = array<i64: 1, 8>}, {transform_indices = @transform_5, window_bounds = array<i64: 8, 8>}]} {
    %c0 = arith.constant 0 : index
    %c0_0 = arith.constant 0 : index
    %0 = vector.load %arg1[%c0, %c0_0] : memref<8x4xf32, #tpu.memory_space<vmem>>, vector<8x4xf32>
    %c0_1 = arith.constant 0 : index
    %c0_2 = arith.constant 0 : index
    %1 = vector.load %arg2[%c0_1, %c0_2] : memref<4x64xf32, #tpu.memory_space<vmem>>, vector<4x64xf32>
    %2 = vector.extract_strided_slice %0 {offsets = [0, 0], sizes = [8, 1], strides = [1, 1]} : vector<8x4xf32> to vector<8x1xf32>
    %3 = vector.extract_strided_slice %1 {offsets = [0, 0], sizes = [1, 64], strides = [1, 1]} : vector<4x64xf32> to vector<1x64xf32>
    %4 = vector.broadcast %2 : vector<8x1xf32> to vector<8x64xf32>
    %5 = vector.broadcast %3 : vector<1x64xf32> to vector<8x64xf32>
    %6 = arith.mulf %4, %5 : vector<8x64xf32>
    %7 = vector.extract_strided_slice %0 {offsets = [0, 1], sizes = [8, 1], strides = [1, 1]} : vector<8x4xf32> to vector<8x1xf32>
    %8 = vector.extract_strided_slice %1 {offsets = [1, 0], sizes = [1, 64], strides = [1, 1]} : vector<4x64xf32> to vector<1x64xf32>
    %9 = vector.broadcast %7 : vector<8x1xf32> to vector<8x64xf32>
    %10 = vector.broadcast %8 : vector<1x64xf32> to vector<8x64xf32>
    %11 = arith.mulf %9, %10 : vector<8x64xf32>
    %12 = arith.addf %6, %11 : vector<8x64xf32>
    %13 = vector.extract_strided_slice %0 {offsets = [0, 2], sizes = [8, 1], strides = [1, 1]} : vector<8x4xf32> to vector<8x1xf32>
    %14 = vector.extract_strided_slice %1 {offsets = [2, 0], sizes = [1, 64], strides = [1, 1]} : vector<4x64xf32> to vector<1x64xf32>
    %15 = vector.broadcast %13 : vector<8x1xf32> to vector<8x64xf32>
    %16 = vector.broadcast %14 : vector<1x64xf32> to vector<8x64xf32>
    %17 = arith.mulf %15, %16 : vector<8x64xf32>
    %18 = arith.addf %12, %17 : vector<8x64xf32>
    %19 = vector.extract_strided_slice %0 {offsets = [0, 3], sizes = [8, 1], strides = [1, 1]} : vector<8x4xf32> to vector<8x1xf32>
    %20 = vector.extract_strided_slice %1 {offsets = [3, 0], sizes = [1, 64], strides = [1, 1]} : vector<4x64xf32> to vector<1x64xf32>
    %21 = vector.broadcast %19 : vector<8x1xf32> to vector<8x64xf32>
    %22 = vector.broadcast %20 : vector<1x64xf32> to vector<8x64xf32>
    %23 = arith.mulf %21, %22 : vector<8x64xf32>
    %24 = arith.addf %18, %23 : vector<8x64xf32>
    %c0_3 = arith.constant 0 : index
    %c0_4 = arith.constant 0 : index
    %25 = vector.load %arg3[%c0_3, %c0_4] : memref<1x64xf32, #tpu.memory_space<vmem>>, vector<1x64xf32>
    %26 = vector.broadcast %25 : vector<1x64xf32> to vector<8x64xf32>
    %27 = arith.addf %24, %26 : vector<8x64xf32>
    %cst = arith.constant 0.000000e+00 : f32
    %28 = vector.broadcast %cst : f32 to vector<8x64xf32>
    %29 = arith.maximumf %27, %28 : vector<8x64xf32>
    %30 = arith.truncf %29 : vector<8x64xf32> to vector<8x64xbf16>
    %c0_5 = arith.constant 0 : index
    %c0_6 = arith.constant 0 : index
    %31 = vector.load %arg4[%c0_5, %c0_6] : memref<64x8xbf16, #tpu.memory_space<vmem>>, vector<64x8xbf16>
    %cst_7 = arith.constant dense<0.000000e+00> : vector<8x8xf32>
    %32 = tpu.matmul %30, %31, %cst_7 {dimension_numbers = #tpu.dot_dimension_numbers<[1], [0], [0], [1], [0, 0, 1, 1], [], []>} : vector<8x64xbf16>, vector<64x8xbf16>, vector<8x8xf32> -> vector<8x8xf32>
    %c0_8 = arith.constant 0 : index
    %c0_9 = arith.constant 0 : index
    %33 = vector.load %arg5[%c0_8, %c0_9] : memref<1x8xf32, #tpu.memory_space<vmem>>, vector<1x8xf32>
    %34 = vector.broadcast %33 : vector<1x8xf32> to vector<8x8xf32>
    %35 = arith.addf %32, %34 : vector<8x8xf32>
    %c0_10 = arith.constant 0 : index
    %c0_11 = arith.constant 0 : index
    %36 = vector.load %arg6[%c0_10, %c0_11] : memref<8x8xf32, #tpu.memory_space<vmem>>, vector<8x8xf32>
    tpu.vector_store %arg6[%c0_10, %c0_11], %35 {strides = array<i32>} : memref<8x8xf32, #tpu.memory_space<vmem>>, vector<8x8xf32>,
    return
  }
  func.func @transform_0(%arg0: i32) -> (i32, i32) {
    %c0_i32 = arith.constant 0 : i32
    %c0_i32_0 = arith.constant 0 : i32
    return %arg0, %c0_i32 : i32, i32
  }
  func.func @transform_1(%arg0: i32) -> (i32, i32) {
    %c0_i32 = arith.constant 0 : i32
    %c0_i32_0 = arith.constant 0 : i32
    %c0_i32_1 = arith.constant 0 : i32
    return %c0_i32, %c0_i32_0 : i32, i32
  }
  func.func @transform_2(%arg0: i32) -> (i32, i32) {
    %c0_i32 = arith.constant 0 : i32
    %c0_i32_0 = arith.constant 0 : i32
    %c0_i32_1 = arith.constant 0 : i32
    return %c0_i32, %c0_i32_0 : i32, i32
  }
  func.func @transform_3(%arg0: i32) -> (i32, i32) {
    %c0_i32 = arith.constant 0 : i32
    %c0_i32_0 = arith.constant 0 : i32
    %c0_i32_1 = arith.constant 0 : i32
    return %c0_i32, %c0_i32_0 : i32, i32
  }
  func.func @transform_4(%arg0: i32) -> (i32, i32) {
    %c0_i32 = arith.constant 0 : i32
    %c0_i32_0 = arith.constant 0 : i32
    %c0_i32_1 = arith.constant 0 : i32
    return %c0_i32, %c0_i32_0 : i32, i32
  }
  func.func @transform_5(%arg0: i32) -> (i32, i32) {
    %c0_i32 = arith.constant 0 : i32
    %c0_i32_0 = arith.constant 0 : i32
    return %arg0, %c0_i32 : i32, i32
  }
}

</mosaic_0001>

<bundles_post_ra>
// kernel: net_forward.1
= control target key start
LH: loop header
LB: loop body
LE: loop exit
PB: predicated region body
PF: predicated region fallthrough
CT: control target
= control target key end

     0   :  { %v201_v0 = vmov 0   ;;  %v202_v2 = vmov 2   ;;  %v203_v4 = vmov 0.0   ;;  %v204_v6 = vmov 1   ;;  %s264_s0 = inlined_call_operand.vmem [shape: f32[8,4], index: 0, kind: input, shape index: {}]   ;;  %s265_s3 = inlined_call_operand.vmem [shape: bf16[64,8], index: 3, kind: input, shape index: {}]   ;;  %s266_s1 = inlined_call_operand.vmem [shape: f32[4,64], index: 1, kind: input, shape index: {}]   ;;  %s267_s2 = inlined_call_operand.vmem [shape: f32[1,64], index: 2, kind: input, shape index: {}]   ;;  %s268_s4 = inlined_call_operand.vmem [shape: f32[1,8], index: 4, kind: input, shape index: {}]   ;;  %s269_s5 = inlined_call_operand.vmem [shape: f32[8,8], index: 5, kind: output, shape index: {}]  }
   0x1   :  { %192 = vset.pattern.permute.xlu0 %v201_v0  ;;  %v21_v1 = vld [vmem:[%s264_s0] sm:$0xff]  ;;  %194 = vset.pattern.permute.xlu1 %v202_v2  ;;  %v197_v3 = vld [vmem:[%s265_s3 + $0x18] sm:$0xff]   ;;  %v198_v5 = vld [vmem:[%s265_s3 + $0x10] sm:$0xff]   ;;  %v205_v7 = vmov 3   ;;  %vm206_vm0 = vmmov 0   ;;  %v28_v10 = vlaneseq  ;;  %vm112_vm1 = vcmask 523264  }
   0x2   :  { %25 = vperm.xlu0 %192, %v21_v1   ;;  %44 = vperm.xlu1 %194, %v21_v1   ;;  %v199_v8 = vld [vmem:[%s265_s3 + $0x8] sm:$0xff]   ;;  %v200_v9 = vld [vmem:[%s265_s3] sm:$0xff]   ;;  %vm156_vm2 = vcmask 64512  }
   0x3   :  { %174 = vmatprep.subr.bf16.mxu0 %v203_v4  ;;  %182 = vmatprep.mubr.msk.bf16.mxu0 %vm206_vm0, %v203_v4  ;;  %v29_v11 = vshrl.u32 %v28_v10, 7  ;;  %v22_v14 = vld [vmem:[%s266_s1] sm:$0xf] }
   0x4   :  { %175 = vmatpush3.bf16.msra.mxu0 %v197_v3  ;;  %v162_v31 = vld [vmem:[%s267_s2] ss:$0 sm:$0xff] }
   0x5   :  { %176 = vmatprep.subr.bf16.mxu0 %v203_v4  ;;  %v30_v12 = vsub.s32 0, %v29_v11  ;;  %v39_v13 = vsub.s32 1, %v29_v11  ;;  %v49_v16 = vsub.s32 2, %v29_v11  ;;  %v59_v18 = vsub.s32 3, %v29_v11  ;;  %v163_v36 = vld [vmem:[%s268_s4] ss:$0 sm:$0xff] }
   0x6   :  { %193 = vset.pattern.permute.xlu0 %v204_v6  ;;  %195 = vset.pattern.permute.xlu1 %v205_v7 }
   0x7   :  { %34 = vperm.xlu0 %193, %v21_v1   ;;  %54 = vperm.xlu1 %195, %v21_v1   ;;  %v31_v19 = vrot.slane %v22_v14, %v30_v12  ;;  %v40_v20 = vrot.slane %v22_v14, %v39_v13  ;;  %v50_v21 = vrot.slane %v22_v14, %v49_v16 }
   0x8   :  { %177 = vmatpush3.bf16.msra.mxu0 %v198_v5  ;;  %v60_v22 = vrot.slane %v22_v14, %v59_v18 }
   0x9   :  { %178 = vmatprep.subr.bf16.mxu0 %v203_v4 }
   0xb   :  { %196 = vset.pattern.permute.xlu0 %v205_v7 }
   0xc   :  { %179 = vmatpush3.bf16.msra.mxu0 %v199_v8 }
   0xd   :  { %180 = vmatprep.subr.bf16.mxu0 %v203_v4 }
  0x10   :  { %181 = vmatpush3.bf16.msra.mxu0 %v200_v9 }
  0x7d   :  { %v26_v15 = vpop.permute.xlu0 %25  ;;  %v45_v17 = vpop.permute.xlu1 %44 }
  0x7e   :  { %v32_v25 = vmul.f32 %v31_v19, %v26_v15  ;;  %v51_v27 = vmul.f32 %v50_v21, %v45_v17 }
  0x82   :  { %v35_v23 = vpop.permute.xlu0 %34  ;;  %v55_v24 = vpop.permute.xlu1 %54 }
  0x83   :  { %v41_v26 = vmul.f32 %v40_v20, %v35_v23  ;;  %v61_v29 = vmul.f32 %v60_v22, %v55_v24 }
  0x85   :  { %v42_v28 = vadd.f32 %v41_v26, %v32_v25 }
  0x87   :  { %v52_v30 = vadd.f32 %v51_v27, %v42_v28 }
  0x89   :  { %v62_v32 = vadd.f32 %v61_v29, %v52_v30 }
  0x8b   :  { %v70_v33 = vadd.f32 %v162_v31, %v62_v32 }
  0x8d   :  { %v71_v34 = vmax.f32 %v70_v33, 0.0 }
  0x8f   :  { %v72_v35 = vpack.c.bf16 %v71_v34, %v71_v34 }
  0x91   :  { %183 = vmatmul.mubr.msk.bf16.vlgmr.msra.gmra.mxu0 %vm112_vm1, %v72_v35 }
 0x151   :  { %v150_v37 = vpop.f32.mrf.mxu0 }
 0x152   :  { %v151_v38 = vadd.f32 %v163_v36, %v150_v37 }
 0x153   :  { %v184_v39 = vpop.f32.mrf.mxu0 }
 0x154   :  { %157 = vst.msk [vmem:[%s269_s5] sm:$0xff] %vm156_vm2, %v151_v38 }
 0x155   :  { %v153_v40 = vpop.f32.mrf.mxu0 }
 0x157   :  { %v185_v41 = vpop.f32.mrf.mxu0 }

</bundles_post_ra>
